<compile_context>
chip_gen: v7x
topology: tpu7x:2x2x1
jax: 0.10.0
libtpu: 0.0.40
codegen_flags: <defaults>
</compile_context>

<pallas_src>
import jax
import jax.numpy as jnp
from jax.experimental import pallas as pl
from jax.experimental.pallas import tpu as pltpu

_HIGHEST = jax.lax.Precision.HIGHEST


def _linear_kernel(x_ref, w_ref, b_ref, h_ref):
    """h = x @ W_all + b, with global row 0 set to -9e15 (sentinel)."""
    h = jnp.dot(x_ref[...], w_ref[...],
                precision=_HIGHEST, preferred_element_type=jnp.float32)
    h = h + b_ref[...]
    tn = h_ref.shape[0]
    row = pl.program_id(0) * tn + jax.lax.broadcasted_iota(jnp.int32, h.shape, 0)
    h = jnp.where(row == 0, jnp.float32(-9e15), h)
    h_ref[...] = h.astype(h_ref.dtype)


def _attn_kernel(a2a_ref, h_all_ref, blk_ref, out_ref, nbr_ref):
    """Per node tile: SMEM-indexed row gather + lane-dense per-head online softmax."""
    tn, hd = out_ref.shape
    k = a2a_ref.shape[1]

    start = pl.multiple_of(pl.program_id(0) * tn, 8)
    h_tile = h_all_ref[pl.ds(start, tn), :]                       # [TN, HD] f32
    blk = blk_ref[...]                                            # [HD, HD] 0/1

    # Per-head self scores, already broadcast across each head's D_out block
    # (lane-dense [TN, HD]): column d holds <h[n], h[n]> restricted to head(d).
    s_self = jnp.dot(h_tile * h_tile, blk,
                     precision=_HIGHEST, preferred_element_type=jnp.float32)

    # Online softmax over the (1 + K) candidates; only the self weight is used.
    m = s_self                                                    # running max
    l = jnp.ones_like(s_self)                                     # exp(s_self - m)

    # Stream the K neighbors: gather one [TN, HD] slab at a time via dynamic row
    # slices of the h_all ref (indices read from SMEM); only running max/exp-sum
    # stay live, so peak intermediates are O(TN*HD).
    for j in range(k):
        # TODO(synk): for large TN switch this unrolled loop to lax.fori_loop or
        # a DMA row-gather; TN is small here so full unroll is fine.
        for n in range(tn):
            idx = a2a_ref[n, j]
            nbr_ref[pl.ds(n, 1), :] = h_all_ref[pl.ds(idx, 1), :]
        h_nbr = nbr_ref[...]                                      # [TN, HD]
        s_j = jnp.dot(h_nbr * h_tile, blk,
                      precision=_HIGHEST, preferred_element_type=jnp.float32)
        m_new = jnp.maximum(m, s_j)
        l = l * jnp.exp(m - m_new) + jnp.exp(s_j - m_new)
        m = m_new

    att_self = jnp.exp(s_self - m) / l                            # exact divide
    out = h_tile * att_self

    # h[0].fill_(0)
    row = start + jax.lax.broadcasted_iota(jnp.int32, out.shape, 0)
    out = jnp.where(row == 0, jnp.float32(0.0), out)
    out_ref[...] = out.astype(out_ref.dtype)


def _round_up(v, m):
    return ((v + m - 1) // m) * m


def multi_head_gat(x, a2a, W, b, *, tile_n_linear=None, tile_n_attn=None):
    """x:[N,D_in] f32, a2a:[N,K] i32, W:[H,D_out,D_in], b:[H,D_out] -> [N, H*D_out]."""
    H, D_out, D_in = W.shape
    N, K = a2a.shape
    HD = H * D_out

    # Decoupled tile sizes: the linear kernel is memory-bound (bigger tiles);
    # the attention kernel's live state scales with TN*HD (smaller tiles).
    if tile_n_attn is None:
        tile_n_attn = min(128, _round_up(N, 8))
    tile_n_attn = max(8, _round_up(tile_n_attn, 8))
    if tile_n_linear is None:
        tile_n_linear = min(512, _round_up(N, 8))
    tile_n_linear = max(tile_n_attn, _round_up(tile_n_linear, tile_n_attn))

    # Pad N up to a multiple of both tiles (tile_n_linear is a multiple of
    # tile_n_attn) instead of falling back to a single whole-array tile.
    N_pad = _round_up(N, tile_n_linear)

    xf = x.astype(jnp.float32)
    a2a_i = jnp.clip(a2a.astype(jnp.int32), 0, N - 1)     # OOB-safe gather indices
    if N_pad != N:
        xf = jnp.pad(xf, ((0, N_pad - N), (0, 0)))
        a2a_i = jnp.pad(a2a_i, ((0, N_pad - N), (0, 0)))   # padded rows -> node 0

    # Fuse heads: W_all[:, h*D_out + j] = W[h, j, :]  (== torch.cat(dim=1) order).
    W_all = jnp.transpose(W, (2, 0, 1)).reshape(D_in, HD).astype(jnp.float32)
    b_all = b.reshape(1, HD).astype(jnp.float32)

    # Block-diagonal head indicator: blk[d, e] = 1 iff head(d) == head(e).
    head_of = jnp.arange(HD, dtype=jnp.int32) // D_out
    blk = (head_of[:, None] == head_of[None, :]).astype(jnp.float32)

    n_lin = N_pad // tile_n_linear
    n_att = N_pad // tile_n_attn

    # Kernel 1: fused per-head linear + row-0 sentinel, node-tiled.
    h_all = pl.pallas_call(
        _linear_kernel,
        out_shape=jax.ShapeDtypeStruct((N_pad, HD), jnp.float32),
        grid_spec=pltpu.PrefetchScalarGridSpec(
            num_scalar_prefetch=0,
            grid=(n_lin,),
            in_specs=[
                pl.BlockSpec((tile_n_linear, D_in), lambda i: (i, 0)),   # x tile
                pl.BlockSpec((D_in, HD), lambda i: (0, 0),
                             pipeline_mode=pl.Buffered(1)),              # W_all
                pl.BlockSpec((1, HD), lambda i: (0, 0),
                             pipeline_mode=pl.Buffered(1)),              # bias
            ],
            out_specs=pl.BlockSpec((tile_n_linear, HD), lambda i: (i, 0)),
        ),
        compiler_params=pltpu.CompilerParams(dimension_semantics=("parallel",)),
    )(xf, W_all, b_all)

    # Explicit VMEM budget for kernel 2 (resident h_all + blk + tile buffers).
    vmem_needed = 4 * (N_pad * HD             # h_all, single-buffered
                       + HD * HD              # blk, single-buffered
                       + 2 * tile_n_attn * HD     # out, double-buffered
                       + tile_n_attn * HD)        # gather scratch
    vmem_limit = int(min(128 * 1024 * 1024,
                         max(16 * 1024 * 1024, 2 * vmem_needed + (2 << 20))))

    # Kernel 2: per node tile, SMEM a2a + row gather + lane-dense online softmax.
    out = pl.pallas_call(
        _attn_kernel,
        out_shape=jax.ShapeDtypeStruct((N_pad, HD), jnp.float32),
        grid_spec=pltpu.PrefetchScalarGridSpec(
            num_scalar_prefetch=0,
            grid=(n_att,),
            in_specs=[
                pl.BlockSpec((tile_n_attn, K), lambda i: (i, 0),
                             memory_space=pltpu.MemorySpace.SMEM),       # a2a idx
                pl.BlockSpec((N_pad, HD), lambda i: (0, 0),
                             pipeline_mode=pl.Buffered(1)),              # h_all
                pl.BlockSpec((HD, HD), lambda i: (0, 0),
                             pipeline_mode=pl.Buffered(1)),              # blk
            ],
            out_specs=pl.BlockSpec((tile_n_attn, HD), lambda i: (i, 0)),
            scratch_shapes=[pltpu.VMEM((tile_n_attn, HD), jnp.float32)],
        ),
        compiler_params=pltpu.CompilerParams(
            dimension_semantics=("parallel",),
            vmem_limit_bytes=vmem_limit),
    )(a2a_i, h_all, blk)

    return out[:N]


def _reference(x, a2a, W, b):
    """Pure-JAX re-implementation of the PyTorch forward (eval mode)."""
    outs = []
    for hidx in range(W.shape[0]):
        h = jnp.dot(x, W[hidx].T, precision=_HIGHEST) + b[hidx]
        h = h.at[0].set(-9e15)
        neighbors = jnp.concatenate([h[:, None, :], h[a2a]], axis=1)   # [N, K+1, D]
        attn = jnp.einsum("nkd,nd->nk", neighbors, h, precision=_HIGHEST)
        attn = jax.nn.softmax(attn, axis=1)
        out = h * attn[:, 0:1]
        out = out.at[0].set(0.0)
        outs.append(out)
    return jnp.concatenate(outs, axis=1)


if __name__ == "__main__":
    # Full-f32 matmuls everywhere so the kernel and the reference agree.
    jax.config.update("jax_default_matmul_precision", "highest")

    N, K = 16, 4            # nodes, neighbors per node
    D_in, D_out, H = 8, 16, 4

    key = jax.random.PRNGKey(0)
    k_x, k_a, k_w, k_b = jax.random.split(key, 4)

    x = jax.random.normal(k_x, (N, D_in), dtype=jnp.float32)
    a2a = jax.random.randint(k_a, (N, K), 0, N, dtype=jnp.int32)

    # nn.Linear default init: U(-1/sqrt(fan_in), 1/sqrt(fan_in)), one layer per head.
    bound = 1.0 / (D_in ** 0.5)
    W = jax.random.uniform(k_w, (H, D_out, D_in), jnp.float32, -bound, bound)
    b = jax.random.uniform(k_b, (H, D_out), jnp.float32, -bound, bound)

    # tile_n=8 exercises the node-tiled grids (2 tiles each) even at toy sizes.
    out = jax.block_until_ready(
        multi_head_gat(x, a2a, W, b, tile_n_linear=8, tile_n_attn=8))
    ref = jax.block_until_ready(_reference(x, a2a, W, b))

    assert out.shape == (N, H * D_out), out.shape
    max_err = float(jnp.max(jnp.abs(out - ref)))
    assert jnp.allclose(out, ref, rtol=2e-3, atol=2e-3), (
        f"kernel != reference (max abs err {max_err})")
    print("KERNEL_OK")
</pallas_src>

<mosaic_0001>
module attributes {stable_mosaic.version = 11 : i64} {
  func.func @_linear_kernel(%arg0: i32, %arg1: memref<8x8xf32, #tpu.memory_space<vmem>>, %arg2: memref<8x64xf32, #tpu.memory_space<vmem>>, %arg3: memref<1x64xf32, #tpu.memory_space<vmem>>, %arg4: memref<8x64xf32, #tpu.memory_space<vmem>>) attributes {dimension_semantics = [#tpu.dimension_semantics<parallel>], iteration_bounds = array<i64: 2>, scalar_prefetch = 0 : i64, scratch_operands = 0 : i64, tpu.core_type = #tpu.core_type<tc>, window_params = [{transform_indices = @transform_0, window_bounds = array<i64: 8, 8>}, {pipeline_mode = #tpu.pipeline_mode<synchronous>, transform_indices = @transform_1, window_bounds = array<i64: 8, 64>}, {pipeline_mode = #tpu.pipeline_mode<synchronous>, transform_indices = @transform_2, window_bounds = array<i64: 1, 64>}, {transform_indices = @transform_3, window_bounds = array<i64: 8, 64>}]} {
    %c0 = arith.constant 0 : index
    %c0_0 = arith.constant 0 : index
    %0 = vector.load %arg1[%c0, %c0_0] : memref<8x8xf32, #tpu.memory_space<vmem>>, vector<8x8xf32>
    %c0_1 = arith.constant 0 : index
    %c0_2 = arith.constant 0 : index
    %1 = vector.load %arg2[%c0_1, %c0_2] : memref<8x64xf32, #tpu.memory_space<vmem>>, vector<8x64xf32>
    %cst = arith.constant dense<0.000000e+00> : vector<8x64xf32>
    %2 = tpu.matmul %0, %1, %cst {dimension_numbers = #tpu.dot_dimension_numbers<[1], [0], [0], [1], [0, 0, 1, 1], [], []>, precision = #tpu.contract_precision<fp32>} : vector<8x8xf32>, vector<8x64xf32>, vector<8x64xf32> -> vector<8x64xf32>
    %c0_3 = arith.constant 0 : index
    %c0_4 = arith.constant 0 : index
    %3 = vector.load %arg3[%c0_3, %c0_4] : memref<1x64xf32, #tpu.memory_space<vmem>>, vector<1x64xf32>
    %4 = vector.broadcast %3 : vector<1x64xf32> to vector<8x64xf32>
    %5 = arith.addf %2, %4 : vector<8x64xf32>
    %c8_i32 = arith.constant 8 : i32
    %6 = arith.muli %arg0, %c8_i32 : i32
    %7 = tpu.iota {dimensions = array<i32: 0>} : vector<8x64xi32>
    %8 = vector.broadcast %6 : i32 to vector<8x64xi32>
    %9 = arith.addi %8, %7 : vector<8x64xi32>
    %c0_i32 = arith.constant 0 : i32
    %10 = vector.broadcast %c0_i32 : i32 to vector<8x64xi32>
    %11 = arith.cmpi eq, %9, %10 : vector<8x64xi32>
    %cst_5 = arith.constant -9.000000e+15 : f32
    %12 = vector.broadcast %cst_5 : f32 to vector<8x64xf32>
    %13 = arith.select %11, %12, %5 : vector<8x64xi1>, vector<8x64xf32>
    %c0_6 = arith.constant 0 : index
    %c0_7 = arith.constant 0 : index
    %14 = vector.load %arg4[%c0_6, %c0_7] : memref<8x64xf32, #tpu.memory_space<vmem>>, vector<8x64xf32>
    tpu.vector_store %arg4[%c0_6, %c0_7], %13 {strides = array<i32>} : memref<8x64xf32, #tpu.memory_space<vmem>>, vector<8x64xf32>,
    return
  }
  func.func @transform_0(%arg0: i32) -> (i32, i32) {
    %c0_i32 = arith.constant 0 : i32
    %c0_i32_0 = arith.constant 0 : i32
    return %arg0, %c0_i32 : i32, i32
  }
  func.func @transform_1(%arg0: i32) -> (i32, i32) {
    %c0_i32 = arith.constant 0 : i32
    %c0_i32_0 = arith.constant 0 : i32
    %c0_i32_1 = arith.constant 0 : i32
    return %c0_i32, %c0_i32_0 : i32, i32
  }
  func.func @transform_2(%arg0: i32) -> (i32, i32) {
    %c0_i32 = arith.constant 0 : i32
    %c0_i32_0 = arith.constant 0 : i32
    %c0_i32_1 = arith.constant 0 : i32
    return %c0_i32, %c0_i32_0 : i32, i32
  }
  func.func @transform_3(%arg0: i32) -> (i32, i32) {
    %c0_i32 = arith.constant 0 : i32
    %c0_i32_0 = arith.constant 0 : i32
    return %arg0, %c0_i32 : i32, i32
  }
}

</mosaic_0001>

<bundles_post_ra>
// kernel: tpu_custom_call.1
= control target key start
LH: loop header
LB: loop body
LE: loop exit
PB: predicated region body
PF: predicated region fallthrough
CT: control target
= control target key end

     0   :  { %8 = vsyncpa [#allocation3], 0  ;;  %s1012_s0 = inlined_call_operand.vmem [shape: f32[16,8], index: 0, kind: input, shape index: {}]   ;;  %s1013_s1 = inlined_call_operand.vmem [shape: f32[8,64], index: 1, kind: input, shape index: {}]   ;;  %s1014_s2 = inlined_call_operand.vmem [shape: f32[1,64], index: 2, kind: input, shape index: {}]   ;;  %s1015_s3 = inlined_call_operand.hbm [shape: f32[16,64], index: 3, kind: output, shape index: {}]  }
   0x1   :  { %10 = vsyncpa [#allocation3 + $0x1], 0  ;;  %s899_s12 = smov 0   ;;  %s901_s13 = smov 0  }
   0x2   :  { %s903_s14 = smov 0   ;;  %s905_s15 = smov 0  }
   0x3 LB: > { %s920_s16 = sadd.s32 4294967295, %s874_s15   ;;  %s707_s17 = sadd.s32 4294967294, %s874_s15   ;;  %s874_s15 = sphi %s905_s15, %s1021_s15   ;;  %s870_s14 = sphi %s903_s14, %s1020_s14   ;;  %s866_s13 = sphi %s901_s13, %s1019_s13   ;;  %s862_s12 = sphi %s899_s12, %s1018_s12  }
   0x4   : > { %s924_s18 = sadd.s32 1, %s874_s15   ;;  %s91_s19 = sadd.s32 1, %s870_s14 }
   0x5   : > { %s88_s20 = ssub.s32 %s874_s15, %s924_s18  ;;  %p101_p0 = scmp.ne.s32.totalorder %s870_s14, %s866_s13 }
   0x6   : > { %p89_p1 = scmp.eq.s32.totalorder %s88_s20, 0  ;;  %p102_p2 = scmp.eq.s32.totalorder %s920_s16, 1 }
   0x7   : > { %p107_p3 = scmp.ne.s32.totalorder %s866_s13, %s862_s12  ;;  %p108_p4 = scmp.eq.s32.totalorder %s707_s17, 1 }
   0x8   : > { %s935_s21 = scalar_select %p89_p1, %s870_s14, %s91_s19  }
   0x9   : > { %p937_p5 = por %p102_p2, %p101_p0  ;;  %p941_p6 = por %p108_p4, %p107_p3 }
   0xa   : > { %p710_p7 = scmp.ge.s32.totalorder %s874_s15, 1  ;;  %p139_p8 = scmp.lt.s32.totalorder %s874_s15, 3 }
   0xc   : > { %p140_p9 = pnand %p710_p7, %p139_p8 }
   0xd   : > { %v167_v0 = vld [vmem:[%s1013_s1] sm:$0xff] (!%p140_p9)  ;;  %p162_p10 = scmp.lt.s32.totalorder (!%p140_p9), %s920_s16, 1  ;;  %v876_v1 = vmov (!%p140_p9), 0.0   ;;  %vm877_vm0 = vmmov (!%p140_p9), 0   ;;  %vm175_vm1 = vcmask (!%p140_p9), 64512   ;;  %v626_v14 = vlaneseq (!%p140_p9)  ;;  %s714_s4 = sshll.u32 (!%p140_p9), %s920_s16, 3 }
   0xe   : > { %143 = sbr.rel (%p140_p9) target bundleno = 284 (0x11c), region = 32  ;;  %746 = vmatprep.subr.mxu0 (!%p140_p9), %v876_v1  ;;  %v180_v2 = vand.u32 (!%p140_p9), 4294901760, %v167_v0  ;;  %748 = vmatprep.mubr.msk.f32.mxu0 (!%p140_p9), %vm877_vm0, %v876_v1  ;;  %s159_s5 = sand.u32 (!%p140_p9), 1, %s866_s13   ;;  %v628_v16 = vstv (!%p140_p9), %s714_s4  ;;  %v713_v19 = vld [vmem:[%s1014_s2] ss:$0 sm:$0xff] (!%p140_p9)  ;;  %vm632_vm3 = vcmask (!%p140_p9), 523264  }
   0xf   : > { %731 = vmatprep.subr.mxu1 (!%p140_p9), %v876_v1  ;;  %733 = vmatprep.mubr.msk.f32.mxu1 (!%p140_p9), %vm877_vm0, %v876_v1  ;;  %v627_v15 = vshrl.u32 (!%p140_p9), %v626_v14, 7  ;;  %s711_s6 = sshll.u32 (!%p140_p9), %s159_s5, 3  ;;  %s716_s9 = sshll.u32 (!%p140_p9), %s920_s16, 7 }
  0x10   : > { %v257_v3 = vsub.f32 (!%p140_p9), %v167_v0, %v180_v2  ;;  %747 = vmatpush3.msra.mxu0 (!%p140_p9), %v180_v2  ;;  %732 = vmatpush3.msra.mxu1 (!%p140_p9), %v180_v2  ;;  %s161_s10 = scalar_lea.vmem (!%p140_p9), [#allocation2], %s711_s6  ;;  %s970_s20 = scalar_lea.hbm (!%p140_p9), %s1015_s3, %s716_s9 }
  0x11   : > { %736 = vmatprep.subr.mxu1 (!%p140_p9), %v876_v1  ;;  %751 = vmatprep.subr.mxu0 (!%p140_p9), %v876_v1  ;;  %v629_v20 = vadd.s32 (!%p140_p9), %v628_v16, %v627_v15  ;;  %s648_s11 = sshll.u32 (!%p140_p9), %s161_s10, 4  ;;  %s635_s24 = scalar_lea.sflag (!%p140_p9), [#allocation3], %s159_s5  ;;  %s972_s11 = int_to_ptr.vmem [resolvable:$true] %s648_s11 }
  0x12   : > { %v258_v6 = vand.u32 (!%p140_p9), 4294901760, %v257_v3  ;;  %s812_s25 = scalar_lea.vmem (!%p140_p9), %s972_s11, 128 }
  0x13   : > { %vm630_vm2 = vcmp.eq.s32.totalorder (!%p140_p9), %v629_v20, 0  ;;  %p813_p11 = scmp.ne.s32.totalorder (!%p140_p9), %s972_s11, %s812_s25 }
  0x14   : > { %v259_v9 = vsub.f32 (!%p140_p9), %v257_v3, %v258_v6 }
  0x15   : > { %s163_s26 = scalar_select %p162_p10, %s920_s16, 1 }
  0x16   : > { %v260_v12 = vand.u32 4294901760, %v259_v9  ;;  %p814_p12 = pnand %p813_p11, %p937_p5  ;;  %s878_s16 = smov [#allocation2]  }
  0x17   : > { %s712_s27 = sshll.u32 %s163_s26, 3  ;;  %s816_s26 = sshll.u32 %s878_s16, 4  ;;  %s817_s26 = int_to_ptr.vmem [resolvable:$false] %s816_s26 }
  0x18   : > { %s165_s30 = scalar_lea.vmem %s1012_s0, %s712_s27  ;;  %p815_p13 = pneg %p814_p12 }
  0x19   : > { %v166_v4 = vld [vmem:[%s165_s30] sm:$0xff]  ;;  %s818_s27 = scalar_lea.vmem %s817_s26, 256  ;;  %p819_p0 = scmp.lt.s32.totalorder %s972_s11, %s817_s26 }
  0x1a   : > { %v177_v5 = vsel %vm175_vm1, %v166_v4, 0  ;;  %p820_p1 = scmp.lt.s32.totalorder %s818_s27, %s812_s25 }
  0x1b   : > { %v245_v7 = vand.u32 4294901760, %v177_v5 }
  0x1c   : > { %p821_p2 = por %p820_p1, %p819_p0 }
  0x1d   : > { %v246_v8 = vsub.f32 %v177_v5, %v245_v7 }
  0x1e   : > { %p822_p3 = pnand %p821_p2, %p815_p13 }
  0x1f   : > { %v247_v10 = vand.u32 4294901760, %v246_v8 }
  0x21   : > { %749 = vmatmul.mubr.f32.vlgmr.msra.gmra.mrb[0].mxu0 %v247_v10  ;;  %v248_v11 = vsub.f32 %v246_v8, %v247_v10 }
  0x22   : > { %752 = vmatpush3.msra.mxu0 %v258_v6  ;;  %753 = vmatprep.mubr.msk.f32.mxu0 %vm877_vm0, %v876_v1 }
  0x23   : > { %v249_v13 = vand.u32 4294901760, %v248_v11  ;;  %756 = vmatprep.subr.mxu0 %v876_v1 }
  0x25   : > { %734 = vmatmul.mubr.f32.vlgmr.msra.gmra.mrb[0].mxu1 %v249_v13 }
  0x26   : > { %737 = vmatpush3.msra.mxu1 %v260_v12  ;;  %738 = vmatprep.mubr.msk.f32.mxu1 %vm877_vm0, %v876_v1 }
  0x27   : > { %741 = vmatprep.subr.mxu1 %v876_v1 }
  0x29   : > { %754 = vmatmul.mubr.f32.vlgmr.msra.gmra.mrb[0].mxu0 %v245_v7 }
  0x2a   : > { %757 = vmatpush3.msra.mxu0 %v180_v2  ;;  %758 = vmatprep.mubr.msk.f32.mxu0 %vm877_vm0, %v876_v1 }
  0x2d   : > { %739 = vmatmul.mubr.f32.vlgmr.msra.gmra.mrb[0].mxu1 %v245_v7 }
  0x2e   : > { %742 = vmatpush3.msra.mxu1 %v257_v3  ;;  %743 = vmatprep.mubr.msk.f32.mxu1 %vm877_vm0, %v876_v1 }
  0x31   : > { %759 = vmatmul.mubr.f32.vlgmr.msra.gmra.mrb[0].mxu0 %v245_v7 }
  0x35   : > { %744 = vmatmul.mubr.f32.vlgmr.msra.gmra.mrb[0].mxu1 %v246_v8 }
 0x104   : > { %v621_v17 = vpop.f32.mrb[0].mxu0 }
 0x105   : > { %v760_v18 = vpop.f32.mrb[1].mxu0 }
 0x108   : > { %v401_v21 = vpop.f32.mrb[0].mxu1 }
 0x109   : > { %v761_v22 = vadd.f32 %v713_v19, %v401_v21  ;;  %v745_v23 = vpop.f32.mrb[1].mxu1 }
 0x10b   : > { %v762_v24 = vadd.f32 %v761_v22, %v621_v17 }
 0x10d   : > { %v631_v25 = vsel %vm630_vm2, -9e+15, %v762_v24 }
 0x10e   : > { %633 = vst.msk [vmem:[%s161_s10] sm:$0xff] %vm632_vm3, %v631_v25 }
 0x10f   : > { %825 = shalt.err (!%p822_p3)
}
 0x110   : > { %s826_s28 = scalar_lea.hbm %s970_s20, 128  ;;  %s830_s4 = scalar_lea.hbm %s1015_s3, 256 }
 0x111   : > { %p827_p4 = scmp.ne.s32.totalorder %s970_s20, %s826_s28  ;;  %p831_p9 = scmp.lt.u32.totalorder %s970_s20, %s1015_s3 }
 0x112   : > { %p832_p10 = scmp.lt.u32.totalorder %s830_s4, %s826_s28  ;;  %p834_p12 = scmp.lt.u32.totalorder %s826_s28, %s970_s20 }
 0x113   : > { %p828_p7 = pnand %p827_p4, %p937_p5 }
 0x114   : > { %p833_p11 = por %p832_p10, %p831_p9 }
 0x115   : > { %p829_p8 = pneg %p828_p7 }
 0x116   : > { %p835_p13 = por %p834_p12, %p833_p11 }
 0x118   : > { %p836_p0 = pnand %p835_p13, %p829_p8 }
 0x11a   : > { %839 = shalt.err (!%p836_p0)
}
 0x11b   : > { %771 = dma.vmem_to_hbm [thread:$0]  (%p937_p5), %s972_s11, 128, %s970_s20, %s635_s24  }
 0x11c PF: > { %p777_p1 = scmp.ge.s32.totalorder %s874_s15, 2  ;;  %s660_s7 = sand.u32 1, %s862_s12  }
 0x11d   : > { %s661_s8 = scalar_lea.sflag [#allocation3], %s660_s7 }
 0x11e   : > { %p774_p2 = pnand %p777_p1, %p941_p6 }
 0x120   : > { %857 = dma.done.wait (!%p774_p2), %s661_s8, 128  }
 0x121   : > { %859 = vsyncadd (!%p774_p2), %s661_s8, 4294967168  ;;  %p13_p3 = scmp.ge.s32.totalorder %s924_s18, 4   ;;  %s1018_s12 = smov %s866_s13 }
 0x122   : > { %s1019_s13 = smov %s870_s14  ;;  %s1020_s14 = smov %s935_s21 }
 0x123   : > { %s1021_s15 = smov %s924_s18  ;;  %15 = sbr.rel (!%p13_p3) target bundleno = 3 (0x3), region = 67 }
 0x12a   :  { %666 = vsyncpa [#allocation3], 1 }
 0x12b   :  { %668 = vsyncpa [#allocation3 + $0x1], 1 }

</bundles_post_ra>
